<compile_context>
chip_gen: v6e
topology: v6e:2x2x1
jax: 0.10.0
libtpu: 0.0.40
codegen_flags: <defaults>
</compile_context>

<pallas_src>
import functools

import jax
import jax.numpy as jnp
from jax import lax
from jax.experimental import pallas as pl
from jax.experimental.pallas import tpu as pltpu


def _round_up(n, m):
    return ((n + m - 1) // m) * m


def _cdiv(a, b):
    return (a + b - 1) // b


# ---------------------------------------------------------------------------
# Kernel
# ---------------------------------------------------------------------------
def _h_theta_kernel(x_ref,
                    w1_ref, b1_ref,
                    w2_ref, b2_ref,
                    w3_ref, b3_ref,
                    w4_ref, b4_ref,
                    w5_ref, b5_ref,
                    o_ref,
                    *, total_rows, bf16_elementwise, mask_tail):
    """Fused 5-layer MLP: (Linear -> ReLU) x4 -> Linear.

    MXU matmuls run in bf16 with f32 accumulation. Bias-add / ReLU run in
    bf16 on chips with a bf16 VPU (v6e / v7x) and in f32 on v5e.
    """

    def layer(h, w_ref, b_ref, relu):
        acc = jnp.dot(h.astype(jnp.bfloat16), w_ref[...],
                      preferred_element_type=jnp.float32)
        if bf16_elementwise:
            acc = acc.astype(jnp.bfloat16) + b_ref[...].astype(jnp.bfloat16)
        else:
            acc = acc + b_ref[...]
        if relu:
            acc = jnp.maximum(acc, 0.0)
        return acc

    x = x_ref[...]
    if mask_tail:
        # Last grid step may read rows past B (stale VMEM). Zero them so no
        # garbage / NaN propagates through the layers (the output rows beyond
        # B are masked on store anyway; this just keeps the datapath clean).
        tm = x.shape[0]
        row = (pl.program_id(0) * tm
               + lax.broadcasted_iota(jnp.int32, (tm, 1), 0))
        x = jnp.where(row < total_rows, x, 0.0)

    h = layer(x, w1_ref, b1_ref, True)
    h = layer(h, w2_ref, b2_ref, True)
    h = layer(h, w3_ref, b3_ref, True)
    h = layer(h, w4_ref, b4_ref, True)
    out = layer(h, w5_ref, b5_ref, False)
    o_ref[...] = out.astype(o_ref.dtype)


# ---------------------------------------------------------------------------
# Parameters
# ---------------------------------------------------------------------------
def init_h_theta_params(key, input_dim, output_dim):
    """f32 params matching torch nn.Linear init. W stored as [in, out]."""
    dims = [input_dim, 400, 300, 200, 100, output_dim]
    params = []
    for i in range(len(dims) - 1):
        fan_in, fan_out = dims[i], dims[i + 1]
        key, kw, kb = jax.random.split(key, 3)
        bound = 1.0 / jnp.sqrt(fan_in)
        W = jax.random.uniform(kw, (fan_in, fan_out), jnp.float32, -bound, bound)
        b = jax.random.uniform(kb, (fan_out,), jnp.float32, -bound, bound)
        params.append((W, b))
    return params


def pack_params_for_kernel(params):
    """Zero-pad every layer's output dim (and the next layer's input dim) to
    a multiple of 128, cast weights to bf16, keep biases f32 as [1, out_pad].

    Padding with zeros is semantically exact: padded lanes stay 0 through the
    bias-add (padded bias entries are 0) and ReLU and contribute nothing to
    the next matmul. Padding granularity is deliberately 128 (not 256): the
    large batch tile keeps the narrow tail-layer RHS resident while many LHS
    slabs stream, without doubling padded FLOPs.
    """
    in_dims = [W.shape[0] for (W, _) in params]
    out_dims = [W.shape[1] for (W, _) in params]
    in_pad = [in_dims[0]] + [_round_up(d, 128) for d in out_dims[:-1]]
    out_pad = [_round_up(d, 128) for d in out_dims]

    packed = []
    for li, (W, b) in enumerate(params):
        Wp = jnp.zeros((in_pad[li], out_pad[li]), jnp.bfloat16)
        Wp = Wp.at[: W.shape[0], : W.shape[1]].set(W.astype(jnp.bfloat16))
        bp = jnp.zeros((1, out_pad[li]), jnp.float32)
        bp = bp.at[0, : b.shape[0]].set(b)
        packed.append((Wp, bp))
    return packed, out_dims[-1], out_pad[-1]


# ---------------------------------------------------------------------------
# Per-chip configuration / tile sizing
# ---------------------------------------------------------------------------
def _device_config():
    try:
        kind = jax.devices()[0].device_kind.lower()
    except Exception:
        kind = ""
    is_v7 = "v7" in kind
    is_v5 = "v5" in kind
    bf16_elementwise = not is_v5                       # v5 VPU has no bf16 path
    vmem_budget_cap = (40 << 20) if is_v7 else (96 << 20)   # tile footprint cap
    vmem_limit_cap = (48 << 20) if is_v7 else (100 << 20)   # scoped-limit cap
    return bf16_elementwise, vmem_budget_cap, vmem_limit_cap


def _tile_footprint_bytes(tile_m, in_dim, out_pad, padded_widths,
                          weight_bytes, bf16_elementwise):
    act_bytes = 2 if bf16_elementwise else 4
    io = 2 * tile_m * in_dim * 4 + 2 * tile_m * out_pad * 4  # dbl-buffered x/out
    inter = tile_m * sum(padded_widths) * act_bytes          # layer activations
    if not bf16_elementwise:
        inter += tile_m * max(padded_widths) * 2             # bf16 cast copies
    return io + weight_bytes + inter                         # weights 1x (Buffered(1))


def _choose_tile_m(B, tile_m_req, in_dim, out_pad, padded_widths,
                   weight_bytes, bf16_elementwise, vmem_budget_cap):
    if B <= 512:
        return max(8, _round_up(B, 8))
    # Keep >=2 grid steps so v7x's two TensorCores both get work; multiple of 256.
    tile = min(tile_m_req, _round_up(_cdiv(B, 2), 256))
    tile = max(512, tile)
    # Step down (v7x mainly) instead of spilling when the footprint is too big.
    while tile > 512 and _tile_footprint_bytes(
            tile, in_dim, out_pad, padded_widths,
            weight_bytes, bf16_elementwise) > vmem_budget_cap:
        tile = max(512, tile - 256)
    return tile


# ---------------------------------------------------------------------------
# Forward
# ---------------------------------------------------------------------------
@functools.partial(
    jax.jit,
    static_argnames=("tile_m", "bf16_elementwise", "vmem_limit_bytes"))
def _h_theta_forward_impl(x, flat_params, *, tile_m, bf16_elementwise,
                          vmem_limit_bytes):
    B, in_dim = x.shape
    out_pad = flat_params[-2].shape[1]
    grid = (_cdiv(B, tile_m),)
    mask_tail = (B % tile_m) != 0

    in_specs = [pl.BlockSpec((tile_m, in_dim), lambda i: (i, 0))]
    for p in flat_params:
        # Constant operands: single-buffered (index_map is constant, so they
        # are DMA'd once and stay resident; no second buffer needed).
        in_specs.append(pl.BlockSpec(p.shape, lambda i: (0, 0),
                                     pipeline_mode=pl.Buffered(1)))
    out_spec = pl.BlockSpec((tile_m, out_pad), lambda i: (i, 0))

    # Cost estimate on the padded problem; weights counted once (resident).
    padded_flops = 0
    weight_bytes = 0
    for idx in range(0, len(flat_params), 2):
        W, b = flat_params[idx], flat_params[idx + 1]
        padded_flops += 2 * B * W.shape[0] * W.shape[1]
        weight_bytes += int(W.size) * W.dtype.itemsize
        weight_bytes += int(b.size) * b.dtype.itemsize
    cost = pl.CostEstimate(
        flops=int(padded_flops),
        transcendentals=0,
        bytes_accessed=int(x.size) * 4 + B * out_pad * 4 + int(weight_bytes))

    kernel = functools.partial(
        _h_theta_kernel, total_rows=B,
        bf16_elementwise=bf16_elementwise, mask_tail=mask_tail)

    return pl.pallas_call(
        kernel,
        out_shape=jax.ShapeDtypeStruct((B, out_pad), jnp.float32),
        grid_spec=pltpu.PrefetchScalarGridSpec(
            num_scalar_prefetch=0,
            grid=grid,
            in_specs=in_specs,
            out_specs=out_spec),
        compiler_params=pltpu.CompilerParams(
            dimension_semantics=("parallel",),
            vmem_limit_bytes=vmem_limit_bytes),
        cost_estimate=cost,
    )(x, *flat_params)


def h_theta_forward(x, packed_params, *, tile_m=2048):
    """x: [B, input_dim] f32; packed_params from pack_params_for_kernel.

    Returns the lane-dense padded output [B, out_pad] f32. The logical result
    is out[:, :out_dim] (padded columns are exactly zero). Returning the
    padded buffer avoids an extra HBM round-trip for a narrow post-kernel
    slice; slice (or fuse) downstream.
    """
    B, in_dim = x.shape
    flat_params = tuple(p for Wb in packed_params for p in Wb)
    out_pad = flat_params[-2].shape[1]
    padded_widths = tuple(W.shape[1] for (W, _) in packed_params)
    weight_bytes = int(sum(int(W.size) * 2 + int(b.size) * 4
                           for (W, b) in packed_params))

    bf16_elementwise, vmem_budget_cap, vmem_limit_cap = _device_config()
    tile_m_eff = _choose_tile_m(B, tile_m, in_dim, out_pad, padded_widths,
                                weight_bytes, bf16_elementwise,
                                vmem_budget_cap)
    footprint = _tile_footprint_bytes(tile_m_eff, in_dim, out_pad,
                                      padded_widths, weight_bytes,
                                      bf16_elementwise)
    vmem_limit = int(min(vmem_limit_cap,
                         max(32 << 20, int(1.5 * footprint) + (4 << 20))))

    return _h_theta_forward_impl(
        x, flat_params, tile_m=tile_m_eff,
        bf16_elementwise=bf16_elementwise, vmem_limit_bytes=vmem_limit)


def h_theta_reference(x, params):
    """Pure-JAX f32 reference of the same forward pass (unpadded params)."""
    h = x
    for i, (W, b) in enumerate(params):
        h = h @ W + b
        if i < len(params) - 1:
            h = jnp.maximum(h, 0.0)
    return h


if __name__ == "__main__":
    key = jax.random.PRNGKey(0)
    input_dim, output_dim = 32, 6
    batch = 10  # intentionally ragged vs the 8-sublane tile

    kx, kp = jax.random.split(key)
    x = jax.random.normal(kx, (batch, input_dim), jnp.float32)
    params = init_h_theta_params(kp, input_dim, output_dim)
    packed, out_dim, out_pad = pack_params_for_kernel(params)

    out_padded = h_theta_forward(x, packed)
    out_padded = jax.block_until_ready(out_padded)
    assert out_padded.shape == (batch, out_pad), out_padded.shape
    out = out_padded[:, :out_dim]  # logical output (padded lanes are zero)

    ref = h_theta_reference(x, params)
    assert out.shape == (batch, output_dim), out.shape
    # bf16 matmuls (and bf16 input cast) with f32 accumulation: loosened
    # tolerance vs the f32 reference.
    assert jnp.allclose(out, ref, atol=5e-2, rtol=5e-2), (
        "mismatch vs reference: max abs err = "
        f"{float(jnp.max(jnp.abs(out - ref)))}")

    print("KERNEL_OK")
</pallas_src>

<mosaic_0001>
module attributes {stable_mosaic.version = 11 : i64} {
  func.func @_h_theta_kernel(%arg0: i32, %arg1: memref<16x32xf32, #tpu.memory_space<vmem>>, %arg2: memref<32x512xbf16, #tpu.memory_space<vmem>>, %arg3: memref<1x512xf32, #tpu.memory_space<vmem>>, %arg4: memref<512x384xbf16, #tpu.memory_space<vmem>>, %arg5: memref<1x384xf32, #tpu.memory_space<vmem>>, %arg6: memref<384x256xbf16, #tpu.memory_space<vmem>>, %arg7: memref<1x256xf32, #tpu.memory_space<vmem>>, %arg8: memref<256x128xbf16, #tpu.memory_space<vmem>>, %arg9: memref<1x128xf32, #tpu.memory_space<vmem>>, %arg10: memref<128x128xbf16, #tpu.memory_space<vmem>>, %arg11: memref<1x128xf32, #tpu.memory_space<vmem>>, %arg12: memref<16x128xf32, #tpu.memory_space<vmem>>) attributes {dimension_semantics = [#tpu.dimension_semantics<parallel>], iteration_bounds = array<i64: 1>, scalar_prefetch = 0 : i64, scratch_operands = 0 : i64, tpu.core_type = #tpu.core_type<tc>, window_params = [{transform_indices = @transform_0, window_bounds = array<i64: 16, 32>}, {pipeline_mode = #tpu.pipeline_mode<synchronous>, transform_indices = @transform_1, window_bounds = array<i64: 32, 512>}, {pipeline_mode = #tpu.pipeline_mode<synchronous>, transform_indices = @transform_2, window_bounds = array<i64: 1, 512>}, {pipeline_mode = #tpu.pipeline_mode<synchronous>, transform_indices = @transform_3, window_bounds = array<i64: 512, 384>}, {pipeline_mode = #tpu.pipeline_mode<synchronous>, transform_indices = @transform_4, window_bounds = array<i64: 1, 384>}, {pipeline_mode = #tpu.pipeline_mode<synchronous>, transform_indices = @transform_5, window_bounds = array<i64: 384, 256>}, {pipeline_mode = #tpu.pipeline_mode<synchronous>, transform_indices = @transform_6, window_bounds = array<i64: 1, 256>}, {pipeline_mode = #tpu.pipeline_mode<synchronous>, transform_indices = @transform_7, window_bounds = array<i64: 256, 128>}, {pipeline_mode = #tpu.pipeline_mode<synchronous>, transform_indices = @transform_8, window_bounds = array<i64: 1, 128>}, {pipeline_mode = #tpu.pipeline_mode<synchronous>, transform_indices = @transform_9, window_bounds = array<i64: 128, 128>}, {pipeline_mode = #tpu.pipeline_mode<synchronous>, transform_indices = @transform_10, window_bounds = array<i64: 1, 128>}, {transform_indices = @transform_11, window_bounds = array<i64: 16, 128>}]} {
    %c0 = arith.constant 0 : index
    %c0_0 = arith.constant 0 : index
    %0 = vector.load %arg1[%c0, %c0_0] : memref<16x32xf32, #tpu.memory_space<vmem>>, vector<16x32xf32>
    %c16_i32 = arith.constant 16 : i32
    %1 = arith.muli %arg0, %c16_i32 : i32
    %2 = tpu.iota {dimensions = array<i32: 0>} : vector<16x1xi32>
    %3 = vector.broadcast %1 : i32 to vector<16x1xi32>
    %4 = arith.addi %3, %2 : vector<16x1xi32>
    %c10_i32 = arith.constant 10 : i32
    %5 = vector.broadcast %c10_i32 : i32 to vector<16x1xi32>
    %6 = arith.cmpi slt, %4, %5 : vector<16x1xi32>
    %cst = arith.constant 0.000000e+00 : f32
    %7 = vector.shape_cast %6 : vector<16x1xi1> to vector<16x1xi1>
    %8 = vector.broadcast %7 : vector<16x1xi1> to vector<16x32xi1>
    %9 = vector.broadcast %cst : f32 to vector<16x32xf32>
    %10 = arith.select %8, %0, %9 : vector<16x32xi1>, vector<16x32xf32>
    %11 = arith.truncf %10 : vector<16x32xf32> to vector<16x32xbf16>
    %c0_1 = arith.constant 0 : index
    %c0_2 = arith.constant 0 : index
    %12 = vector.load %arg2[%c0_1, %c0_2] : memref<32x512xbf16, #tpu.memory_space<vmem>>, vector<32x512xbf16>
    %cst_3 = arith.constant dense<0.000000e+00> : vector<16x512xf32>
    %13 = tpu.matmul %11, %12, %cst_3 {dimension_numbers = #tpu.dot_dimension_numbers<[1], [0], [0], [1], [0, 0, 1, 1], [], []>} : vector<16x32xbf16>, vector<32x512xbf16>, vector<16x512xf32> -> vector<16x512xf32>
    %14 = arith.truncf %13 : vector<16x512xf32> to vector<16x512xbf16>
    %c0_4 = arith.constant 0 : index
    %c0_5 = arith.constant 0 : index
    %15 = vector.load %arg3[%c0_4, %c0_5] : memref<1x512xf32, #tpu.memory_space<vmem>>, vector<1x512xf32>
    %16 = arith.truncf %15 : vector<1x512xf32> to vector<1x512xbf16>
    %17 = vector.broadcast %16 : vector<1x512xbf16> to vector<16x512xbf16>
    %18 = arith.addf %14, %17 : vector<16x512xbf16>
    %cst_6 = arith.constant 0.000000e+00 : bf16
    %19 = vector.broadcast %cst_6 : bf16 to vector<16x512xbf16>
    %20 = arith.maximumf %18, %19 : vector<16x512xbf16>
    %c0_7 = arith.constant 0 : index
    %c0_8 = arith.constant 0 : index
    %21 = vector.load %arg4[%c0_7, %c0_8] : memref<512x384xbf16, #tpu.memory_space<vmem>>, vector<512x384xbf16>
    %cst_9 = arith.constant dense<0.000000e+00> : vector<16x384xf32>
    %22 = tpu.matmul %20, %21, %cst_9 {dimension_numbers = #tpu.dot_dimension_numbers<[1], [0], [0], [1], [0, 0, 1, 1], [], []>} : vector<16x512xbf16>, vector<512x384xbf16>, vector<16x384xf32> -> vector<16x384xf32>
    %23 = arith.truncf %22 : vector<16x384xf32> to vector<16x384xbf16>
    %c0_10 = arith.constant 0 : index
    %c0_11 = arith.constant 0 : index
    %24 = vector.load %arg5[%c0_10, %c0_11] : memref<1x384xf32, #tpu.memory_space<vmem>>, vector<1x384xf32>
    %25 = arith.truncf %24 : vector<1x384xf32> to vector<1x384xbf16>
    %26 = vector.broadcast %25 : vector<1x384xbf16> to vector<16x384xbf16>
    %27 = arith.addf %23, %26 : vector<16x384xbf16>
    %cst_12 = arith.constant 0.000000e+00 : bf16
    %28 = vector.broadcast %cst_12 : bf16 to vector<16x384xbf16>
    %29 = arith.maximumf %27, %28 : vector<16x384xbf16>
    %c0_13 = arith.constant 0 : index
    %c0_14 = arith.constant 0 : index
    %30 = vector.load %arg6[%c0_13, %c0_14] : memref<384x256xbf16, #tpu.memory_space<vmem>>, vector<384x256xbf16>
    %cst_15 = arith.constant dense<0.000000e+00> : vector<16x256xf32>
    %31 = tpu.matmul %29, %30, %cst_15 {dimension_numbers = #tpu.dot_dimension_numbers<[1], [0], [0], [1], [0, 0, 1, 1], [], []>} : vector<16x384xbf16>, vector<384x256xbf16>, vector<16x256xf32> -> vector<16x256xf32>
    %32 = arith.truncf %31 : vector<16x256xf32> to vector<16x256xbf16>
    %c0_16 = arith.constant 0 : index
    %c0_17 = arith.constant 0 : index
    %33 = vector.load %arg7[%c0_16, %c0_17] : memref<1x256xf32, #tpu.memory_space<vmem>>, vector<1x256xf32>
    %34 = arith.truncf %33 : vector<1x256xf32> to vector<1x256xbf16>
    %35 = vector.broadcast %34 : vector<1x256xbf16> to vector<16x256xbf16>
    %36 = arith.addf %32, %35 : vector<16x256xbf16>
    %cst_18 = arith.constant 0.000000e+00 : bf16
    %37 = vector.broadcast %cst_18 : bf16 to vector<16x256xbf16>
    %38 = arith.maximumf %36, %37 : vector<16x256xbf16>
    %c0_19 = arith.constant 0 : index
    %c0_20 = arith.constant 0 : index
    %39 = vector.load %arg8[%c0_19, %c0_20] : memref<256x128xbf16, #tpu.memory_space<vmem>>, vector<256x128xbf16>
    %cst_21 = arith.constant dense<0.000000e+00> : vector<16x128xf32>
    %40 = tpu.matmul %38, %39, %cst_21 {dimension_numbers = #tpu.dot_dimension_numbers<[1], [0], [0], [1], [0, 0, 1, 1], [], []>} : vector<16x256xbf16>, vector<256x128xbf16>, vector<16x128xf32> -> vector<16x128xf32>
    %41 = arith.truncf %40 : vector<16x128xf32> to vector<16x128xbf16>
    %c0_22 = arith.constant 0 : index
    %c0_23 = arith.constant 0 : index
    %42 = vector.load %arg9[%c0_22, %c0_23] : memref<1x128xf32, #tpu.memory_space<vmem>>, vector<1x128xf32>
    %43 = arith.truncf %42 : vector<1x128xf32> to vector<1x128xbf16>
    %44 = vector.broadcast %43 : vector<1x128xbf16> to vector<16x128xbf16>
    %45 = arith.addf %41, %44 : vector<16x128xbf16>
    %cst_24 = arith.constant 0.000000e+00 : bf16
    %46 = vector.broadcast %cst_24 : bf16 to vector<16x128xbf16>
    %47 = arith.maximumf %45, %46 : vector<16x128xbf16>
    %c0_25 = arith.constant 0 : index
    %c0_26 = arith.constant 0 : index
    %48 = vector.load %arg10[%c0_25, %c0_26] : memref<128x128xbf16, #tpu.memory_space<vmem>>, vector<128x128xbf16>
    %cst_27 = arith.constant dense<0.000000e+00> : vector<16x128xf32>
    %49 = tpu.matmul %47, %48, %cst_27 {dimension_numbers = #tpu.dot_dimension_numbers<[1], [0], [0], [1], [0, 0, 1, 1], [], []>} : vector<16x128xbf16>, vector<128x128xbf16>, vector<16x128xf32> -> vector<16x128xf32>
    %50 = arith.truncf %49 : vector<16x128xf32> to vector<16x128xbf16>
    %c0_28 = arith.constant 0 : index
    %c0_29 = arith.constant 0 : index
    %51 = vector.load %arg11[%c0_28, %c0_29] : memref<1x128xf32, #tpu.memory_space<vmem>>, vector<1x128xf32>
    %52 = arith.truncf %51 : vector<1x128xf32> to vector<1x128xbf16>
    %53 = vector.broadcast %52 : vector<1x128xbf16> to vector<16x128xbf16>
    %54 = arith.addf %50, %53 : vector<16x128xbf16>
    %55 = arith.extf %54 : vector<16x128xbf16> to vector<16x128xf32>
    %c0_30 = arith.constant 0 : index
    %c0_31 = arith.constant 0 : index
    %56 = vector.load %arg12[%c0_30, %c0_31] : memref<16x128xf32, #tpu.memory_space<vmem>>, vector<16x128xf32>
    tpu.vector_store %arg12[%c0_30, %c0_31], %55 {strides = array<i32>} : memref<16x128xf32, #tpu.memory_space<vmem>>, vector<16x128xf32>,
    return
  }
  func.func @transform_0(%arg0: i32) -> (i32, i32) {
    %c0_i32 = arith.constant 0 : i32
    %c0_i32_0 = arith.constant 0 : i32
    return %arg0, %c0_i32 : i32, i32
  }
  func.func @transform_1(%arg0: i32) -> (i32, i32) {
    %c0_i32 = arith.constant 0 : i32
    %c0_i32_0 = arith.constant 0 : i32
    %c0_i32_1 = arith.constant 0 : i32
    return %c0_i32, %c0_i32_0 : i32, i32
  }
  func.func @transform_2(%arg0: i32) -> (i32, i32) {
    %c0_i32 = arith.constant 0 : i32
    %c0_i32_0 = arith.constant 0 : i32
    %c0_i32_1 = arith.constant 0 : i32
    return %c0_i32, %c0_i32_0 : i32, i32
  }
  func.func @transform_3(%arg0: i32) -> (i32, i32) {
    %c0_i32 = arith.constant 0 : i32
    %c0_i32_0 = arith.constant 0 : i32
    %c0_i32_1 = arith.constant 0 : i32
    return %c0_i32, %c0_i32_0 : i32, i32
  }
  func.func @transform_4(%arg0: i32) -> (i32, i32) {
    %c0_i32 = arith.constant 0 : i32
    %c0_i32_0 = arith.constant 0 : i32
    %c0_i32_1 = arith.constant 0 : i32
    return %c0_i32, %c0_i32_0 : i32, i32
  }
  func.func @transform_5(%arg0: i32) -> (i32, i32) {
    %c0_i32 = arith.constant 0 : i32
    %c0_i32_0 = arith.constant 0 : i32
    %c0_i32_1 = arith.constant 0 : i32
    return %c0_i32, %c0_i32_0 : i32, i32
  }
  func.func @transform_6(%arg0: i32) -> (i32, i32) {
    %c0_i32 = arith.constant 0 : i32
    %c0_i32_0 = arith.constant 0 : i32
    %c0_i32_1 = arith.constant 0 : i32
    return %c0_i32, %c0_i32_0 : i32, i32
  }
  func.func @transform_7(%arg0: i32) -> (i32, i32) {
    %c0_i32 = arith.constant 0 : i32
    %c0_i32_0 = arith.constant 0 : i32
    %c0_i32_1 = arith.constant 0 : i32
    return %c0_i32, %c0_i32_0 : i32, i32
  }
  func.func @transform_8(%arg0: i32) -> (i32, i32) {
    %c0_i32 = arith.constant 0 : i32
    %c0_i32_0 = arith.constant 0 : i32
    %c0_i32_1 = arith.constant 0 : i32
    return %c0_i32, %c0_i32_0 : i32, i32
  }
  func.func @transform_9(%arg0: i32) -> (i32, i32) {
    %c0_i32 = arith.constant 0 : i32
    %c0_i32_0 = arith.constant 0 : i32
    %c0_i32_1 = arith.constant 0 : i32
    return %c0_i32, %c0_i32_0 : i32, i32
  }
  func.func @transform_10(%arg0: i32) -> (i32, i32) {
    %c0_i32 = arith.constant 0 : i32
    %c0_i32_0 = arith.constant 0 : i32
    %c0_i32_1 = arith.constant 0 : i32
    return %c0_i32, %c0_i32_0 : i32, i32
  }
  func.func @transform_11(%arg0: i32) -> (i32, i32) {
    %c0_i32 = arith.constant 0 : i32
    %c0_i32_0 = arith.constant 0 : i32
    return %arg0, %c0_i32 : i32, i32
  }
}

</mosaic_0001>

<bundles_post_ra>
// kernel: _h_theta_forward_impl.1
= control target key start
LH: loop header
LB: loop body
LE: loop exit
PB: predicated region body
PF: predicated region fallthrough
CT: control target
= control target key end

     0   :  { %16 = vsyncpa [#allocation3], 0  ;;  %s2825_s0 = inlined_call_operand.hbm [shape: f32[10,32], index: 0, kind: input, shape index: {}]   ;;  %s2826_s1 = inlined_call_operand.hbm [shape: bf16[32,512], index: 1, kind: input, shape index: {}]   ;;  %s2827_s2 = inlined_call_operand.hbm [shape: f32[1,512], index: 2, kind: input, shape index: {}]   ;;  %s2828_s3 = inlined_call_operand.hbm [shape: bf16[512,384], index: 3, kind: input, shape index: {}]   ;;  %s2829_s4 = inlined_call_operand.vmem [shape: f32[1,384], index: 4, kind: input, shape index: {}]   ;;  %s2830_s5 = inlined_call_operand.hbm [shape: bf16[384,256], index: 5, kind: input, shape index: {}]   ;;  %s2831_s6 = inlined_call_operand.vmem [shape: f32[1,256], index: 6, kind: input, shape index: {}]   ;;  %s2832_s7 = inlined_call_operand.hbm [shape: bf16[256,128], index: 7, kind: input, shape index: {}]   ;;  %s2833_s8 = inlined_call_operand.vmem [shape: f32[1,128], index: 8, kind: input, shape index: {}]   ;;  %s2834_s9 = inlined_call_operand.hbm [shape: bf16[128,128], index: 9, kind: input, shape index: {}]   ;;  %s2835_s10 = inlined_call_operand.vmem [shape: f32[1,128], index: 10, kind: input, shape index: {}]   ;;  %s2836_s11 = inlined_call_operand.hbm [shape: f32[10,128], index: 11, kind: output, shape index: {}]  }
   0x1   :  { %17 = vsyncpa [#allocation6], 0 }
   0x2   :  { %18 = vsyncpa [#allocation9], 0 }
   0x3   :  { %19 = vsyncpa [#allocation12], 0 }
   0x4   :  { %20 = vsyncpa [#allocation4], 0  ;;  %s2640_s17 = smov [#allocation5]  }
   0x5   :  { %s38_s18 = sshll.u32 %s2640_s17, 4  ;;  %s39_s18 = int_to_ptr.vmem [resolvable:$true] %s38_s18 }
   0x6   :  { %s2478_s19 = scalar_lea.vmem %s39_s18, 1024  ;;  %p2483_p1 = scmp.lt.s32.totalorder %s39_s18, %s39_s18 }
   0x7   :  { %p2479_p0 = scmp.ne.s32.totalorder %s39_s18, %s2478_s19  ;;  %p2484_p2 = scmp.lt.s32.totalorder %s2478_s19, %s2478_s19 }
   0x9   :  { %p2485_p3 = por %p2484_p2, %p2483_p1 }
   0xb   :  { %p2486_p4 = pnand %p2485_p3, %p2479_p0 }
   0xd   :  { %2489 = shalt.err (!%p2486_p4)
}
   0xe   :  { %s2641_s20 = smov 256   ;;  %s2642_s21 = smov 16  }
   0xf   :  { %44 = dma.hbm_to_vmem [thread:$0]  %s2826_s1, 1024, %s39_s18, [#allocation6], %s2641_s20, %s2641_s20, %s2642_s21  }
  0x10   :  { %s2643_s24 = smov [#allocation8]  }
  0x11   :  { %s60_s25 = sshll.u32 %s2643_s24, 4  ;;  %s61_s25 = int_to_ptr.vmem [resolvable:$true] %s60_s25 }
  0x12   :  { %s2498_s26 = scalar_lea.vmem %s61_s25, 12288  ;;  %p2503_p6 = scmp.lt.s32.totalorder %s61_s25, %s61_s25 }
  0x13   :  { %p2499_p5 = scmp.ne.s32.totalorder %s61_s25, %s2498_s26  ;;  %p2504_p7 = scmp.lt.s32.totalorder %s2498_s26, %s2498_s26 }
  0x15   :  { %p2505_p8 = por %p2504_p7, %p2503_p6 }
  0x17   :  { %p2506_p9 = pnand %p2505_p8, %p2499_p5 }
  0x19   :  { %2509 = shalt.err (!%p2506_p9)
}
  0x1a   :  { %s2644_s27 = smov 192   ;;  %s2645_s28 = smov 12  }
  0x1b   :  { %66 = dma.hbm_to_vmem [thread:$0]  %s2828_s3, 12288, %s61_s25, [#allocation9], %s2644_s27, %s2644_s27, %s2645_s28  }
  0x1c   :  { %s2646_s12 = smov [#allocation11]  }
  0x1d   :  { %s88_s13 = sshll.u32 %s2646_s12, 4  ;;  %s89_s13 = int_to_ptr.vmem [resolvable:$true] %s88_s13 }
  0x1e   :  { %s2518_s1 = scalar_lea.vmem %s89_s13, 2048  ;;  %p2523_p11 = scmp.lt.s32.totalorder %s89_s13, %s89_s13 }
  0x1f   :  { %p2519_p10 = scmp.ne.s32.totalorder %s89_s13, %s2518_s1  ;;  %p2524_p12 = scmp.lt.s32.totalorder %s2518_s1, %s2518_s1 }
  0x21   :  { %p2525_p13 = por %p2524_p12, %p2523_p11 }
  0x23   :  { %p2526_p0 = pnand %p2525_p13, %p2519_p10 }
  0x25   :  { %2529 = shalt.err (!%p2526_p0)
}
  0x26   :  { %s2647_s14 = smov 64   ;;  %s2648_s15 = smov 4  }
  0x27   :  { %94 = dma.hbm_to_vmem [thread:$0]  %s2832_s7, 2048, %s89_s13, [#allocation12], %s2647_s14, %s2647_s14, %s2648_s15  }
  0x28   :  { %s2649_s3 = smov [#allocation2]  }
  0x29   :  { %s26_s18 = sshll.u32 %s2649_s3, 4  ;;  %s27_s18 = int_to_ptr.vmem [resolvable:$true] %s26_s18 }
  0x2a   :  { %s2538_s19 = scalar_lea.vmem %s27_s18, 256  ;;  %p2543_p2 = scmp.lt.s32.totalorder %s27_s18, %s27_s18 }
  0x2b   :  { %p2539_p1 = scmp.ne.s32.totalorder %s27_s18, %s2538_s19  ;;  %p2544_p3 = scmp.lt.s32.totalorder %s2538_s19, %s2538_s19 }
  0x2d   :  { %p2545_p4 = por %p2544_p3, %p2543_p2 }
  0x2f   :  { %p2546_p5 = pnand %p2545_p4, %p2539_p1 }
  0x31   :  { %2549 = shalt.err (!%p2546_p5)
}
  0x32   :  { %s2650_s20 = smov 128   ;;  %s2651_s21 = smov 8  }
  0x33   :  { %32 = dma.hbm_to_vmem [thread:$0]  %s2825_s0, 256, %s27_s18, [#allocation3], %s2650_s20, %s2650_s20, %s2651_s21  }
  0x34   :  { %s2652_s7 = smov [#allocation7]   ;;  %s2653_s25 = smov [#allocation10]  }
  0x35   :  { %s51_s24 = sshll.u32 %s2652_s7, 4  ;;  %s74_s26 = sshll.u32 %s2653_s25, 4  ;;  %s52_s24 = int_to_ptr.vmem [resolvable:$true] %s51_s24  ;;  %s75_s26 = int_to_ptr.vmem [resolvable:$true] %s74_s26 }
  0x36   :  { %s2558_s27 = scalar_lea.vmem %s52_s24, 64  ;;  %p2563_p7 = scmp.lt.s32.totalorder %s52_s24, %s52_s24 }
  0x37   :  { %p2559_p6 = scmp.ne.s32.totalorder %s52_s24, %s2558_s27  ;;  %p2564_p8 = scmp.lt.s32.totalorder %s2558_s27, %s2558_s27 }
  0x39   :  { %p2565_p9 = por %p2564_p8, %p2563_p7 }
  0x3b   :  { %p2566_p10 = pnand %p2565_p9, %p2559_p6 }
  0x3d   :  { %2569 = shalt.err (!%p2566_p10)
}
  0x3e   :  { %54 = dma.hbm_to_vmem [thread:$0]  %s2827_s2, 64, %s52_s24, [#allocation6]  }
  0x3f   :  { %s2578_s30 = scalar_lea.vmem %s75_s26, 6144  ;;  %p2583_p12 = scmp.lt.s32.totalorder %s75_s26, %s75_s26 }
  0x40   :  { %p2579_p11 = scmp.ne.s32.totalorder %s75_s26, %s2578_s30  ;;  %p2584_p13 = scmp.lt.s32.totalorder %s2578_s30, %s2578_s30 }
  0x42   :  { %p2585_p0 = por %p2584_p13, %p2583_p12 }
  0x44   :  { %p2586_p1 = pnand %p2585_p0, %p2579_p11 }
  0x46   :  { %2589 = shalt.err (!%p2586_p1)
}
  0x47   :  { %80 = dma.hbm_to_vmem [thread:$0]  %s2830_s5, 6144, %s75_s26, [#allocation9], %s2650_s20, %s2650_s20, %s2651_s21  }
  0x48   :  { %s2654_s13 = smov [#allocation13]  }
  0x49   :  { %s102_s1 = sshll.u32 %s2654_s13, 4  ;;  %s103_s1 = int_to_ptr.vmem [resolvable:$true] %s102_s1 }
  0x4a   :  { %s2598_s16 = scalar_lea.vmem %s103_s1, 1024  ;;  %p2603_p3 = scmp.lt.s32.totalorder %s103_s1, %s103_s1 }
  0x4b   :  { %p2599_p2 = scmp.ne.s32.totalorder %s103_s1, %s2598_s16  ;;  %p2604_p4 = scmp.lt.s32.totalorder %s2598_s16, %s2598_s16 }
  0x4d   :  { %p2605_p5 = por %p2604_p4, %p2603_p3 }
  0x4f   :  { %p2606_p6 = pnand %p2605_p5, %p2599_p2 }
  0x51   :  { %2609 = shalt.err (!%p2606_p6)
}
  0x52   :  { %108 = dma.hbm_to_vmem [thread:$0]  %s2834_s9, 1024, %s103_s1, [#allocation12], %s2647_s14, %s2647_s14, %s2648_s15  }
  0x53   :  { %2630 = dma.done.wait [#allocation3], 256  }
  0x54   :  { %2631 = vsyncadd [#allocation3], 4294967040 }
  0x55   :  { %2632 = dma.done.wait [#allocation6], 1088  }
  0x56   :  { %2633 = vsyncadd [#allocation6], 4294966208 }
  0x57   :  { %2634 = dma.done.wait [#allocation9], 18432  }
  0x58   :  { %2635 = vsyncadd [#allocation9], 4294948864 }
  0x59   :  { %2636 = dma.done.wait [#allocation12], 3072  }
  0x5a   :  { %2637 = vsyncadd [#allocation12], 4294964224  ;;  %v136_v0 = vlaneseq  ;;  %v2655_v1 = vmov 0   ;;  %v2234_v4 = vld [vmem:[#allocation5 + $0x24] ss:$16 sps:$4 sm:$0xff]   ;;  %v134_v9 = vld [vmem:[#allocation2 + $0x8] sm:$0xff] }
  0x5b   :  { %235 = vmatprep.mubr.bf16.mxu1 %v2655_v1  ;;  %v2236_v5 = vld [vmem:[#allocation5 + $0x20] ss:$16 sps:$4 sm:$0xff]   ;;  %215 = vmatprep.subr.bf16.mxu1 %v2234_v4  ;;  %v2237_v6 = vld [vmem:[#allocation5 + $0x4] ss:$16 sps:$4 sm:$0xff]   ;;  %v2242_v11 = vld [vmem:[#allocation5 + $0x2c] ss:$16 sps:$4 sm:$0xff]  }
  0x5c   :  { %v2753_v2 = vshrl.u32 %v136_v0, 7  ;;  %v2239_v7 = vld [vmem:[#allocation5] ss:$16 sps:$4 sm:$0xff]   ;;  %216 = vmatpush1.bf16.msra.mxu1 %v2236_v5  ;;  %v2240_v12 = vld [vmem:[#allocation5 + $0x28] ss:$16 sps:$4 sm:$0xff]   ;;  %vm199_vm1 = vcmask 261120  }
  0x5d   :  { %v133_v8 = vld [vmem:[#allocation2] sm:$0xff]  ;;  %217 = vmatprep.subr.bf16.mxu1 %v2237_v6  ;;  %v2248_v15 = vld [vmem:[#allocation8 + $0xa8] ss:$12 sps:$4 sm:$0xff]   ;;  %v2257_v22 = vld [vmem:[#allocation8 + $0x78] ss:$12 sps:$4 sm:$0xff]   ;;  %vm2657_vm2 = vmmov 0  }
  0x5e   :  { %v138_v3 = vadd.s32 8, %v2753_v2  ;;  %v2246_v14 = vld [vmem:[#allocation8 + $0xac] ss:$12 sps:$4 sm:$0xff]   ;;  %v2249_v17 = vld [vmem:[#allocation8 + $0x94] ss:$12 sps:$4 sm:$0xff]  }
  0x5f   :  { %v2245_v16 = vld [vmem:[#allocation5 + $0xc] ss:$16 sps:$4 sm:$0xff]   ;;  %995 = vmatprep.subr.bf16.mxu0 %v2246_v14  ;;  %v2251_v18 = vld [vmem:[#allocation8 + $0x90] ss:$12 sps:$4 sm:$0xff]   ;;  %v2243_v20 = vld [vmem:[#allocation5 + $0x8] ss:$16 sps:$4 sm:$0xff]  }
  0x60   :  { %vm143_vm0 = vcmp.lt.s32.totalorder %v138_v3, 10  ;;  %218 = vmatpush1.bf16.msra.mxu1 %v2239_v7  ;;  %996 = vmatpush1.bf16.msra.mxu0 %v2248_v15  ;;  %v2252_v19 = vld [vmem:[#allocation8 + $0x7c] ss:$12 sps:$4 sm:$0xff]   ;;  %v2256_v21 = vld [vmem:[#allocation8 + $0x22c] ss:$12 sps:$4 sm:$0xff]  }
  0x61   :  { %v149_v10 = vsel %vm143_vm0, %v134_v9, 0.0  ;;  %258 = vmatprep.subr.bf16.mxu1 %v2242_v11  ;;  %997 = vmatprep.subr.bf16.mxu0 %v2249_v17  ;;  %v2258_v23 = vld [vmem:[#allocation8 + $0x64] ss:$12 sps:$4 sm:$0xff]   ;;  %v2254_v24 = vld [vmem:[#allocation8 + $0x228] ss:$12 sps:$4 sm:$0xff]  }
  0x62   :  { %v150_v13 = vpack.c.bf16 %v149_v10, %v133_v8  ;;  %v2262_v25 = vld [vmem:[#allocation8 + $0x214] ss:$12 sps:$4 sm:$0xff]   ;;  %v2264_v27 = vld [vmem:[#allocation8 + $0x4c] ss:$12 sps:$4 sm:$0xff]   ;;  %v2260_v28 = vld [vmem:[#allocation8 + $0x210] ss:$12 sps:$4 sm:$0xff]  }
  0x63   :  { %v2263_v26 = vld [vmem:[#allocation8 + $0x60] ss:$12 sps:$4 sm:$0xff]   ;;  %v2268_v29 = vld [vmem:[#allocation8 + $0x1fc] ss:$12 sps:$4 sm:$0xff]   ;;  %v2266_v32 = vld [vmem:[#allocation8 + $0x1f8] ss:$12 sps:$4 sm:$0xff]  }
  0x64   :  { %1950 = vmatmul.mubr.msk.bf16.vlgmr.msra.gmra.mxu1 %vm199_vm1, %v150_v13  ;;  %998 = vmatpush1.bf16.msra.mxu0 %v2251_v18  ;;  %v2269_v30 = vld [vmem:[#allocation8 + $0x48] ss:$12 sps:$4 sm:$0xff]   ;;  %v2274_v33 = vld [vmem:[#allocation8 + $0x1e4] ss:$12 sps:$4 sm:$0xff]   ;;  %v2272_v36 = vld [vmem:[#allocation8 + $0x1e0] ss:$12 sps:$4 sm:$0xff]  }
  0x65   :  { %259 = vmatpush1.bf16.msra.mxu1 %v2240_v12  ;;  %278 = vmatprep.mubr.bf16.mxu1 %v2655_v1  ;;  %v2270_v31 = vld [vmem:[#allocation8 + $0x34] ss:$12 sps:$4 sm:$0xff]   ;;  %v2275_v34 = vld [vmem:[#allocation8 + $0x30] ss:$12 sps:$4 sm:$0xff]   ;;  %v2280_v37 = vld [vmem:[#allocation8 + $0x1cc] ss:$12 sps:$4 sm:$0xff]  }
  0x66   :  { %260 = vmatprep.subr.bf16.mxu1 %v2245_v16  ;;  %999 = vmatprep.subr.bf16.mxu0 %v2252_v19  ;;  %v2276_v35 = vld [vmem:[#allocation8 + $0x1c] ss:$12 sps:$4 sm:$0xff]   ;;  %v2281_v38 = vld [vmem:[#allocation8 + $0x18] ss:$12 sps:$4 sm:$0xff]   ;;  %v2286_v41 = vld [vmem:[#allocation8 + $0x1b4] ss:$12 sps:$4 sm:$0xff]  }
  0x67   :  { %v2282_v39 = vld [vmem:[#allocation8 + $0x4] ss:$12 sps:$4 sm:$0xff]   ;;  %v2278_v40 = vld [vmem:[#allocation8 + $0x1c8] ss:$12 sps:$4 sm:$0xff]   ;;  %v2287_v42 = vld [vmem:[#allocation8] ss:$12 sps:$4 sm:$0xff]  }
  0x68   :  { %1000 = vmatpush1.bf16.msra.mxu0 %v2257_v22  ;;  %v2288_v43 = vld [vmem:[#allocation8 + $0x16c] ss:$12 sps:$4 sm:$0xff]   ;;  %v2284_v44 = vld [vmem:[#allocation8 + $0x1b0] ss:$12 sps:$4 sm:$0xff]   ;;  %v2293_v47 = vld [vmem:[#allocation8 + $0x168] ss:$12 sps:$4 sm:$0xff]  }
  0x69   :  { %261 = vmatpush1.bf16.msra.mxu1 %v2243_v20  ;;  %1001 = vmatprep.subr.bf16.mxu0 %v2258_v23  ;;  %v2292_v45 = vld [vmem:[#allocation8 + $0x19c] ss:$12 sps:$4 sm:$0xff]   ;;  %v2290_v46 = vld [vmem:[#allocation8 + $0x198] ss:$12 sps:$4 sm:$0xff]   ;;  %v2294_v48 = vld [vmem:[#allocation8 + $0x154] ss:$12 sps:$4 sm:$0xff]  }
  0x6a   :  { %1038 = vmatprep.subr.bf16.mxu1 %v2256_v21  ;;  %v2298_v49 = vld [vmem:[#allocation8 + $0x184] ss:$12 sps:$4 sm:$0xff]   ;;  %v2300_v51 = vld [vmem:[#allocation8 + $0x13c] ss:$12 sps:$4 sm:$0xff]   ;;  %v2296_v52 = vld [vmem:[#allocation8 + $0x180] ss:$12 sps:$4 sm:$0xff]  }
  0x6b   :  { %v2299_v50 = vld [vmem:[#allocation8 + $0x150] ss:$12 sps:$4 sm:$0xff]   ;;  %v2304_v53 = vld [vmem:[#allocation8 + $0x2ec] ss:$12 sps:$4 sm:$0xff]   ;;  %v2302_v56 = vld [vmem:[#allocation8 + $0x2e8] ss:$12 sps:$4 sm:$0xff]  }
  0x6c   :  { %1951 = vmatmul.mubr.msk.bf16.vlgmr.msra.gmra.mxu1 %vm199_vm1, %v150_v13  ;;  %1002 = vmatpush1.bf16.msra.mxu0 %v2263_v26  ;;  %v2305_v54 = vld [vmem:[#allocation8 + $0x138] ss:$12 sps:$4 sm:$0xff]   ;;  %v2310_v57 = vld [vmem:[#allocation8 + $0x2d4] ss:$12 sps:$4 sm:$0xff]   ;;  %v2308_v60 = vld [vmem:[#allocation8 + $0x2d0] ss:$12 sps:$4 sm:$0xff]  }
  0x6d   :  { %1039 = vmatpush1.bf16.msra.mxu1 %v2254_v24  ;;  %1003 = vmatprep.subr.bf16.mxu0 %v2264_v27  ;;  %v2306_v55 = vld [vmem:[#allocation8 + $0x124] ss:$12 sps:$4 sm:$0xff]   ;;  %v2311_v58 = vld [vmem:[#allocation8 + $0x120] ss:$12 sps:$4 sm:$0xff]   ;;  %v2316_v61 = vld [vmem:[#allocation8 + $0x2bc] ss:$12 sps:$4 sm:$0xff]  }
  0x6e   :  { %1040 = vmatprep.subr.bf16.mxu1 %v2262_v25  ;;  %v2312_v59 = vld [vmem:[#allocation8 + $0x10c] ss:$12 sps:$4 sm:$0xff]   ;;  %v2317_v62 = vld [vmem:[#allocation8 + $0x108] ss:$12 sps:$4 sm:$0xff]   ;;  %v2322_v3 = vld [vmem:[#allocation8 + $0x2a4] ss:$12 sps:$4 sm:$0xff]  }
  0x6f   :  { %v2314_v63 = vld [vmem:[#allocation8 + $0x2b8] ss:$12 sps:$4 sm:$0xff]   ;;  %v2318_v0 = vld [vmem:[#allocation8 + $0xf4] ss:$12 sps:$4 sm:$0xff]   ;;  %v2323_v5 = vld [vmem:[#allocation8 + $0xf0] ss:$12 sps:$4 sm:$0xff]  }
  0x70   :  { %1004 = vmatpush1.bf16.msra.mxu0 %v2269_v30  ;;  %v2320_v4 = vld [vmem:[#allocation8 + $0x2a0] ss:$12 sps:$4 sm:$0xff]   ;;  %v2324_v6 = vld [vmem:[#allocation8 + $0xdc] ss:$12 sps:$4 sm:$0xff]   ;;  %v2329_v9 = vld [vmem:[#allocation8 + $0xd8] ss:$12 sps:$4 sm:$0xff]  }
  0x71   :  { %1041 = vmatpush1.bf16.msra.mxu1 %v2260_v28  ;;  %1005 = vmatprep.subr.bf16.mxu0 %v2270_v31  ;;  %v2328_v7 = vld [vmem:[#allocation8 + $0x28c] ss:$12 sps:$4 sm:$0xff]   ;;  %v2326_v8 = vld [vmem:[#allocation8 + $0x288] ss:$12 sps:$4 sm:$0xff]   ;;  %v2330_v10 = vld [vmem:[#allocation8 + $0xc4] ss:$12 sps:$4 sm:$0xff]  }
  0x72   :  { %1042 = vmatprep.subr.bf16.mxu1 %v2268_v29  ;;  %v2334_v11 = vld [vmem:[#allocation8 + $0x274] ss:$12 sps:$4 sm:$0xff]   ;;  %v2332_v12 = vld [vmem:[#allocation8 + $0x270] ss:$12 sps:$4 sm:$0xff]   ;;  %v2336_v16 = vld [vmem:[#allocation8 + $0x258] ss:$12 sps:$4 sm:$0xff]  }
  0x73   :  { %v2335_v13 = vld [vmem:[#allocation8 + $0xc0] ss:$12 sps:$4 sm:$0xff]   ;;  %v2338_v14 = vld [vmem:[#allocation8 + $0x25c] ss:$12 sps:$4 sm:$0xff]   ;;  %v2343_v17 = vld [vmem:[#allocation8 + $0x244] ss:$12 sps:$4 sm:$0xff]  }
  0x74   :  { %1006 = vmatpush1.bf16.msra.mxu0 %v2275_v34  ;;  %v2339_v15 = vld [vmem:[#allocation8 + $0x170] ss:$12 sps:$4 sm:$0xff]   ;;  %v2341_v18 = vld [vmem:[#allocation8 + $0x240] ss:$12 sps:$4 sm:$0xff]   ;;  %v2760_v20 = vsub.s32 0, %v2753_v2  ;;  %v2763_v22 = vsub.s32 1, %v2753_v2 }
  0x75   :  { %1043 = vmatpush1.bf16.msra.mxu1 %v2266_v32  ;;  %1007 = vmatprep.subr.bf16.mxu0 %v2276_v35  ;;  %v2347_v19 = vld [vmem:[#allocation8 + $0x2f0] ss:$12 sps:$4 sm:$0xff]   ;;  %v305_v26 = vsub.s32 2, %v2753_v2  ;;  %v309_v28 = vsub.s32 3, %v2753_v2 }
  0x76   :  { %1044 = vmatprep.subr.bf16.mxu1 %v2274_v33  ;;  %v293_v21 = vld [vmem:[#allocation7] sm:$0xf] }
  0x77   :  { %v298_v23 = vrot.slane %v293_v21, %v2760_v20  ;;  %v302_v24 = vrot.slane %v293_v21, %v2763_v22  ;;  %v306_v31 = vrot.slane %v293_v21, %v305_v26  ;;  %v310_v33 = vrot.slane %v293_v21, %v309_v28  ;;  %v2365_v21 = vld [vmem:[#allocation8 + $0x1d0] ss:$12 sps:$4 sm:$0xff]   ;;  %v2370_v28 = vld [vmem:[#allocation8 + $0x260] ss:$12 sps:$4 sm:$0xff]  }
  0x78   :  { %1008 = vmatpush1.bf16.msra.mxu0 %v2281_v38 }
  0x79   :  { %1045 = vmatpush1.bf16.msra.mxu1 %v2272_v36  ;;  %1009 = vmatprep.subr.bf16.mxu0 %v2282_v39  ;;  %v315_v25 = vpack.c.bf16 %v298_v23, %v298_v23  ;;  %v316_v27 = vpack.c.bf16 %v302_v24, %v302_v24  ;;  %v2366_v23 = vld [vmem:[#allocation8 + $0xc8] ss:$12 sps:$4 sm:$0xff]   ;;  %v2367_v24 = vld [vmem:[#allocation8 + $0x278] ss:$12 sps:$4 sm:$0xff]  }
  0x7a   :  { %1046 = vmatprep.subr.bf16.mxu1 %v2280_v37  ;;  %v317_v37 = vpack.c.bf16 %v306_v31, %v306_v31  ;;  %v2374_v31 = vld [vmem:[#allocation10 + $0x70] ss:$8 sps:$4 sm:$0xff]  }
  0x7b   :  { %v320_v30 = vpack.i.b16 %v315_v25, %v315_v25  ;;  %v327_v32 = vpack.i.b16 %v316_v27, %v316_v27  ;;  %v2368_v25 = vld [vmem:[#allocation8 + $0x8] ss:$12 sps:$4 sm:$0xff]   ;;  %v2369_v27 = vld [vmem:[#allocation8 + $0x1b8] ss:$12 sps:$4 sm:$0xff]  }
  0x7c   :  { %1010 = vmatpush1.bf16.msra.mxu0 %v2287_v42 }
  0x7d   :  { %1047 = vmatpush1.bf16.msra.mxu1 %v2278_v40  ;;  %1011 = vmatprep.subr.bf16.mxu0 %v2288_v43  ;;  %v325_v36 = vrot.slane %v320_v30, %v2760_v20  ;;  %v332_v39 = vrot.slane %v327_v32, %v2760_v20  ;;  %v318_v40 = vpack.c.bf16 %v310_v33, %v310_v33  ;;  %v2371_v30 = vld [vmem:[#allocation8 + $0x1a0] ss:$12 sps:$4 sm:$0xff]   ;;  %v2372_v32 = vld [vmem:[#allocation8 + $0x248] ss:$12 sps:$4 sm:$0xff]  }
  0x7e   :  { %1048 = vmatprep.subr.bf16.mxu1 %v2286_v41  ;;  %v2379_v33 = vld [vmem:[#allocation10 + $0x64] ss:$8 sps:$4 sm:$0xff]  }
  0x80   :  { %1012 = vmatpush2.bf16.msra.mxu0 %v2293_v47  ;;  %v341_v47 = vpack.i.b16 %v318_v40, %v318_v40  ;;  %v2388_v40 = vld [vmem:[#allocation10 + $0x34] ss:$8 sps:$4 sm:$0xff]  }
  0x81   :  { %1049 = vmatpush1.bf16.msra.mxu1 %v2284_v44  ;;  %1013 = vmatprep.subr.bf16.mxu0 %v2294_v48 }
  0x82   :  { %1050 = vmatprep.subr.bf16.mxu1 %v2292_v45  ;;  %v334_v45 = vpack.i.b16 %v317_v37, %v317_v37  ;;  %v2380_v37 = vld [vmem:[#allocation10 + $0x50] ss:$8 sps:$4 sm:$0xff]  }
  0x84   :  { %1014 = vmatpush2.bf16.msra.mxu0 %v2299_v50  ;;  %v2340_v50 = vld [vmem:[#allocation8 + $0xb0] ss:$12 sps:$4 sm:$0xff]  }
  0x85   :  { %1051 = vmatpush1.bf16.msra.mxu1 %v2290_v46  ;;  %1015 = vmatprep.subr.bf16.mxu0 %v2300_v51 }
  0x86   :  { %1052 = vmatprep.subr.bf16.mxu1 %v2298_v49 }
  0x88   :  { %1016 = vmatpush2.bf16.msra.mxu0 %v2305_v54  ;;  %v2344_v54 = vld [vmem:[#allocation8 + $0x158] ss:$12 sps:$4 sm:$0xff]  }
  0x89   :  { %1053 = vmatpush1.bf16.msra.mxu1 %v2296_v52  ;;  %1017 = vmatprep.subr.bf16.mxu0 %v2306_v55  ;;  %v339_v52 = vrot.slane %v334_v45, %v2760_v20  ;;  %v2392_v45 = vld [vmem:[#allocation10 + $0x10] ss:$8 sps:$4 sm:$0xff]  }
  0x8a   :  { %1054 = vmatprep.subr.bf16.mxu1 %v2304_v53 }
  0x8c   :  { %1018 = vmatpush2.bf16.msra.mxu0 %v2311_v58 }
  0x8d   :  { %1055 = vmatpush2.bf16.msra.mxu1 %v2302_v56  ;;  %1019 = vmatprep.subr.bf16.mxu0 %v2312_v59  ;;  %v346_v56 = vrot.slane %v341_v47, %v2760_v20  ;;  %v2345_v59 = vld [vmem:[#allocation8 + $0x98] ss:$12 sps:$4 sm:$0xff]   ;;  %v2395_v47 = vld [vmem:[#allocation10] ss:$8 sps:$4 sm:$0xff]  }
  0x8e   :  { %1056 = vmatprep.subr.bf16.mxu1 %v2310_v57 }
  0x90   :  { %1020 = vmatpush2.bf16.msra.mxu0 %v2317_v62 }
  0x91   :  { %1057 = vmatpush2.bf16.msra.mxu1 %v2308_v60  ;;  %1021 = vmatprep.subr.bf16.mxu0 %v2318_v0  ;;  %v2348_v0 = vld [vmem:[#allocation8 + $0x80] ss:$12 sps:$4 sm:$0xff]  }
  0x92   :  { %1058 = vmatprep.subr.bf16.mxu1 %v2316_v61  ;;  %v2346_v61 = vld [vmem:[#allocation8 + $0x140] ss:$12 sps:$4 sm:$0xff]  }
  0x94   :  { %1022 = vmatpush2.bf16.msra.mxu0 %v2323_v5  ;;  %v2350_v5 = vld [vmem:[#allocation8 + $0x128] ss:$12 sps:$4 sm:$0xff]  }
  0x95   :  { %1059 = vmatpush2.bf16.msra.mxu1 %v2314_v63  ;;  %1023 = vmatprep.subr.bf16.mxu0 %v2324_v6  ;;  %v2351_v6 = vld [vmem:[#allocation8 + $0x2d8] ss:$12 sps:$4 sm:$0xff]  }
  0x96   :  { %1060 = vmatprep.subr.bf16.mxu1 %v2322_v3  ;;  %v2349_v3 = vld [vmem:[#allocation8 + $0x230] ss:$12 sps:$4 sm:$0xff]  }
  0x98   :  { %1024 = vmatpush2.bf16.msra.mxu0 %v2329_v9  ;;  %v2354_v9 = vld [vmem:[#allocation8 + $0x110] ss:$12 sps:$4 sm:$0xff]  }
  0x99   :  { %1061 = vmatpush2.bf16.msra.mxu1 %v2320_v4  ;;  %1025 = vmatprep.subr.bf16.mxu0 %v2330_v10  ;;  %v2355_v10 = vld [vmem:[#allocation8 + $0x2c0] ss:$12 sps:$4 sm:$0xff]  }
  0x9a   :  { %1062 = vmatprep.subr.bf16.mxu1 %v2328_v7  ;;  %v2352_v7 = vld [vmem:[#allocation8 + $0x68] ss:$12 sps:$4 sm:$0xff]  }
  0x9c   :  { %1026 = vmatpush2.bf16.msra.mxu0 %v2335_v13  ;;  %v2358_v13 = vld [vmem:[#allocation8 + $0xf8] ss:$12 sps:$4 sm:$0xff]  }
  0x9d   :  { %1063 = vmatpush2.bf16.msra.mxu1 %v2326_v8  ;;  %2120 = vmatprep.subr.bf16.mxu0 %v2339_v15  ;;  %v2353_v8 = vld [vmem:[#allocation8 + $0x218] ss:$12 sps:$4 sm:$0xff]  }
  0x9e   :  { %1064 = vmatprep.subr.bf16.mxu1 %v2334_v11  ;;  %v2356_v11 = vld [vmem:[#allocation8 + $0x50] ss:$12 sps:$4 sm:$0xff]   ;;  %v2360_v15 = vld [vmem:[#allocation8 + $0x38] ss:$12 sps:$4 sm:$0xff]  }
  0xa1   :  { %1065 = vmatpush2.bf16.msra.mxu1 %v2332_v12  ;;  %v2357_v12 = vld [vmem:[#allocation8 + $0x200] ss:$12 sps:$4 sm:$0xff]  }
  0xa2   :  { %1066 = vmatprep.subr.bf16.mxu1 %v2338_v14  ;;  %v2359_v14 = vld [vmem:[#allocation8 + $0x2a8] ss:$12 sps:$4 sm:$0xff]  }
  0xa5   :  { %1067 = vmatpush2.bf16.msra.mxu1 %v2336_v16  ;;  %v2361_v16 = vld [vmem:[#allocation8 + $0x1e8] ss:$12 sps:$4 sm:$0xff]  }
  0xa6   :  { %1068 = vmatprep.subr.bf16.mxu1 %v2343_v17  ;;  %v2362_v17 = vld [vmem:[#allocation8 + $0xe0] ss:$12 sps:$4 sm:$0xff]  }
  0xa9   :  { %1069 = vmatpush2.bf16.msra.mxu1 %v2341_v18  ;;  %v2363_v18 = vld [vmem:[#allocation8 + $0x290] ss:$12 sps:$4 sm:$0xff]  }
  0xaa   :  { %2142 = vmatprep.subr.bf16.mxu1 %v2347_v19  ;;  %v2364_v19 = vld [vmem:[#allocation8 + $0x20] ss:$12 sps:$4 sm:$0xff]  }
 0x124   :  { %v237_v29 = vpop.f32.mrf.mxu1 }
 0x126   :  { %v239_v34 = vpop.f32.mrf.mxu1 }
 0x128   :  { %v241_v35 = vpop.f32.mrf.mxu1 }
 0x129   :  { %v289_v38 = vpack.c.bf16 %v241_v35, %v237_v29  ;;  %v2376_v29 = vld [vmem:[#allocation10 + $0x74] ss:$8 sps:$4 sm:$0xff]   ;;  %v2377_v35 = vld [vmem:[#allocation10 + $0x60] ss:$8 sps:$4 sm:$0xff]  }
 0x12a   :  { %v243_v41 = vpop.f32.mrf.mxu1 }
 0x12b   :  { %v290_v42 = vpack.c.bf16 %v243_v41, %v239_v34  ;;  %v347_v43 = vadd.bf16 %v325_v36, %v289_v38  ;;  %v2373_v34 = vld [vmem:[#allocation8 + $0x188] ss:$12 sps:$4 sm:$0xff]   ;;  %v2385_v38 = vld [vmem:[#allocation10 + $0x44] ss:$8 sps:$4 sm:$0xff]   ;;  %v2386_v41 = vld [vmem:[#allocation10 + $0x30] ss:$8 sps:$4 sm:$0xff]  }
 0x12c   :  { %v280_v44 = vpop.f32.mrf.mxu1  ;;  %v2382_v36 = vld [vmem:[#allocation10 + $0x54] ss:$8 sps:$4 sm:$0xff]  }
 0x12d   :  { %v348_v46 = vadd.bf16 %v332_v39, %v290_v42  ;;  %v2776_v53 = vmax.bf16 %v2655_v1, %v347_v43  ;;  %v2383_v39 = vld [vmem:[#allocation10 + $0x40] ss:$8 sps:$4 sm:$0xff]   ;;  %v2391_v42 = vld [vmem:[#allocation10 + $0x24] ss:$8 sps:$4 sm:$0xff]  }
 0x12e   :  { %v282_v48 = vpop.f32.mrf.mxu1  ;;  %v2389_v43 = vld [vmem:[#allocation10 + $0x20] ss:$8 sps:$4 sm:$0xff]  }
 0x12f   :  { %v352_v49 = vmax.bf16 %v2655_v1, %v348_v46  ;;  %v2397_v46 = vld [vmem:[#allocation10 + $0x4] ss:$8 sps:$4 sm:$0xff]  }
 0x130   :  { %v284_v51 = vpop.f32.mrf.mxu1 }
 0x131   :  { %v291_v55 = vpack.c.bf16 %v284_v51, %v280_v44  ;;  %1027 = vmatprep.mubr.bf16.mxu0 %v352_v49  ;;  %v2394_v44 = vld [vmem:[#allocation10 + $0x14] ss:$8 sps:$4 sm:$0xff]   ;;  %v2401_v51 = vld [vmem:[#allocation10 + $0xe0] ss:$8 sps:$4 sm:$0xff]  }
 0x132   :  { %v286_v57 = vpop.f32.mrf.mxu1  ;;  %1028 = vmatmul.mubr.bf16.vlgmr.msra.gmra.mxu0 %v2776_v53 }
 0x133   :  { %v292_v58 = vpack.c.bf16 %v286_v57, %v282_v48  ;;  %2121 = vmatpush3.bf16.msra.mxu0 %v2340_v50  ;;  %1113 = vmatprep.mubr.bf16.mxu0 %v352_v49  ;;  %v349_v60 = vadd.bf16 %v339_v52, %v291_v55  ;;  %v2400_v48 = vld [vmem:[#allocation10 + $0xf4] ss:$8 sps:$4 sm:$0xff]   ;;  %v2398_v49 = vld [vmem:[#allocation10 + $0xf0] ss:$8 sps:$4 sm:$0xff]   ;;  %v2403_v50 = vld [vmem:[#allocation10 + $0xe4] ss:$8 sps:$4 sm:$0xff]  }
 0x134   :  { %2122 = vmatprep.subr.bf16.mxu0 %v2344_v54  ;;  %v2406_v52 = vld [vmem:[#allocation10 + $0xd4] ss:$8 sps:$4 sm:$0xff]   ;;  %v2409_v54 = vld [vmem:[#allocation10 + $0xc4] ss:$8 sps:$4 sm:$0xff]   ;;  %v2407_v55 = vld [vmem:[#allocation10 + $0xc0] ss:$8 sps:$4 sm:$0xff]  }
 0x135   :  { %v350_v62 = vadd.bf16 %v346_v56, %v292_v58  ;;  %v2782_v4 = vmax.bf16 %v2655_v1, %v349_v60  ;;  %v2412_v56 = vld [vmem:[#allocation10 + $0xb4] ss:$8 sps:$4 sm:$0xff]   ;;  %v2410_v57 = vld [vmem:[#allocation10 + $0xb0] ss:$8 sps:$4 sm:$0xff]   ;;  %v2415_v58 = vld [vmem:[#allocation10 + $0xa4] ss:$8 sps:$4 sm:$0xff]  }
 0x136   :  { %v2418_v60 = vld [vmem:[#allocation10 + $0x94] ss:$8 sps:$4 sm:$0xff]  }
 0x137   :  { %2123 = vmatpush3.bf16.msra.mxu0 %v2345_v59  ;;  %v354_v63 = vmax.bf16 %v2655_v1, %v350_v62  ;;  %v2413_v59 = vld [vmem:[#allocation10 + $0xa0] ss:$8 sps:$4 sm:$0xff]   ;;  %v2421_v62 = vld [vmem:[#allocation10 + $0x84] ss:$8 sps:$4 sm:$0xff]  }
 0x138   :  { %2124 = vmatprep.subr.bf16.mxu0 %v2346_v61  ;;  %v2416_v61 = vld [vmem:[#allocation10 + $0x90] ss:$8 sps:$4 sm:$0xff]  }
 0x139   :  { %1070 = vmatprep.mubr.bf16.mxu1 %v354_v63 }
 0x13a   :  { %1071 = vmatmul.mubr.bf16.vlgmr.msra.gmra.mxu1 %v2782_v4 }
 0x13b   :  { %2125 = vmatpush3.bf16.msra.mxu0 %v2348_v0  ;;  %2143 = vmatpush3.bf16.msra.mxu1 %v2349_v3  ;;  %v2422_v0 = vld [vmem:[#allocation10 + $0x170] ss:$8 sps:$4 sm:$0xff]   ;;  %v2427_v3 = vld [vmem:[#allocation10 + $0x164] ss:$8 sps:$4 sm:$0xff]  }
 0x13c   :  { %1154 = vmatprep.mubr.bf16.mxu1 %v354_v63  ;;  %2126 = vmatprep.subr.bf16.mxu0 %v2350_v5  ;;  %v2424_v63 = vld [vmem:[#allocation10 + $0x174] ss:$8 sps:$4 sm:$0xff]   ;;  %v2425_v5 = vld [vmem:[#allocation10 + $0x160] ss:$8 sps:$4 sm:$0xff]  }
 0x13d   :  { %2144 = vmatprep.subr.bf16.mxu1 %v2351_v6  ;;  %v2430_v6 = vld [vmem:[#allocation10 + $0x154] ss:$8 sps:$4 sm:$0xff]  }
 0x13f   :  { %2127 = vmatpush3.bf16.msra.mxu0 %v2352_v7  ;;  %2145 = vmatpush3.bf16.msra.mxu1 %v2353_v8  ;;  %v2428_v7 = vld [vmem:[#allocation10 + $0x150] ss:$8 sps:$4 sm:$0xff]   ;;  %v2433_v8 = vld [vmem:[#allocation10 + $0x144] ss:$8 sps:$4 sm:$0xff]  }
 0x140   :  { %2128 = vmatprep.subr.bf16.mxu0 %v2354_v9  ;;  %2146 = vmatprep.subr.bf16.mxu1 %v2355_v10  ;;  %v2431_v9 = vld [vmem:[#allocation10 + $0x140] ss:$8 sps:$4 sm:$0xff]   ;;  %v2436_v10 = vld [vmem:[#allocation10 + $0x134] ss:$8 sps:$4 sm:$0xff]  }
 0x143   :  { %2129 = vmatpush3.bf16.msra.mxu0 %v2356_v11  ;;  %2147 = vmatpush3.bf16.msra.mxu1 %v2357_v12  ;;  %v2434_v11 = vld [vmem:[#allocation10 + $0x130] ss:$8 sps:$4 sm:$0xff]   ;;  %v2439_v12 = vld [vmem:[#allocation10 + $0x124] ss:$8 sps:$4 sm:$0xff]  }
 0x144   :  { %2130 = vmatprep.subr.bf16.mxu0 %v2358_v13  ;;  %2148 = vmatprep.subr.bf16.mxu1 %v2359_v14  ;;  %v2437_v13 = vld [vmem:[#allocation10 + $0x120] ss:$8 sps:$4 sm:$0xff]   ;;  %v2442_v14 = vld [vmem:[#allocation10 + $0x114] ss:$8 sps:$4 sm:$0xff]  }
 0x147   :  { %2131 = vmatpush3.bf16.msra.mxu0 %v2360_v15  ;;  %2149 = vmatpush3.bf16.msra.mxu1 %v2361_v16  ;;  %v2440_v15 = vld [vmem:[#allocation10 + $0x110] ss:$8 sps:$4 sm:$0xff]   ;;  %v2445_v16 = vld [vmem:[#allocation10 + $0x104] ss:$8 sps:$4 sm:$0xff]  }
 0x148   :  { %2132 = vmatprep.subr.bf16.mxu0 %v2362_v17  ;;  %2150 = vmatprep.subr.bf16.mxu1 %v2363_v18  ;;  %v2443_v17 = vld [vmem:[#allocation10 + $0x100] ss:$8 sps:$4 sm:$0xff]   ;;  %v1166_v18 = vld [vmem:[%s2829_s4] sm:$0x7] }
 0x14b   :  { %2133 = vmatpush3.bf16.msra.mxu0 %v2364_v19  ;;  %2151 = vmatpush3.bf16.msra.mxu1 %v2365_v21  ;;  %v1171_v21 = vrot.slane %v1166_v18, %v2760_v20 }
 0x14c   :  { %2134 = vmatprep.subr.bf16.mxu0 %v2366_v23  ;;  %2152 = vmatprep.subr.bf16.mxu1 %v2367_v24  ;;  %v1175_v23 = vrot.slane %v1166_v18, %v2763_v22 }
 0x14f   :  { %2135 = vmatpush3.bf16.msra.mxu0 %v2368_v25  ;;  %2153 = vmatpush3.bf16.msra.mxu1 %v2369_v27  ;;  %v1183_v25 = vpack.c.bf16 %v1171_v21, %v1171_v21  ;;  %v1184_v27 = vpack.c.bf16 %v1175_v23, %v1175_v23  ;;  %v2461_v21 = vld [vmem:[#allocation11] sm:$0xff]   ;;  %v2462_v23 = vld [vmem:[#allocation13 + $0x38] sm:$0xff]  }
 0x150   :  { %2154 = vmatprep.subr.bf16.mxu1 %v2370_v28  ;;  %1501 = vmatprep.subr.bf16.mxu0 %v2376_v29 }
 0x152   :  { %1114 = vmatmul.mubr.bf16.vlgmr.msra.gmra.mxu0 %v2776_v53  ;;  %v2404_v53 = vld [vmem:[#allocation10 + $0xd0] ss:$8 sps:$4 sm:$0xff]  }
 0x153   :  { %2155 = vmatpush3.bf16.msra.mxu1 %v2371_v30  ;;  %1502 = vmatpush1.bf16.msra.mxu0 %v2374_v31  ;;  %v1187_v31 = vpack.i.b16 %v1183_v25, %v1183_v25  ;;  %v2463_v25 = vld [vmem:[#allocation13 + $0x30] sm:$0xff]  }
 0x154   :  { %2156 = vmatprep.subr.bf16.mxu1 %v2372_v32  ;;  %1503 = vmatprep.subr.bf16.mxu0 %v2379_v33  ;;  %v1194_v32 = vpack.i.b16 %v1184_v27, %v1184_v27  ;;  %v2464_v27 = vld [vmem:[#allocation13 + $0x28] sm:$0xff]  }
 0x157   :  { %2157 = vmatpush3.bf16.msra.mxu1 %v2373_v34  ;;  %1504 = vmatpush1.bf16.msra.mxu0 %v2377_v35 }
 0x158   :  { %1505 = vmatprep.subr.bf16.mxu0 %v2382_v36  ;;  %1544 = vmatprep.subr.bf16.mxu1 %v2424_v63 }
 0x15a   :  { %1155 = vmatmul.mubr.bf16.vlgmr.msra.gmra.mxu1 %v2782_v4  ;;  %v2419_v4 = vld [vmem:[#allocation10 + $0x80] ss:$8 sps:$4 sm:$0xff]  }
 0x15b   :  { %1506 = vmatpush1.bf16.msra.mxu0 %v2380_v37  ;;  %1576 = vmatprep.mubr.bf16.mxu1 %v2655_v1  ;;  %v1192_v37 = vrot.slane %v1187_v31, %v2760_v20 }
 0x15c   :  { %1507 = vmatprep.subr.bf16.mxu0 %v2385_v38  ;;  %1545 = vmatpush1.bf16.msra.mxu1 %v2422_v0 }
 0x15d   :  { %1546 = vmatprep.subr.bf16.mxu1 %v2427_v3 }
 0x15f   :  { %1508 = vmatpush1.bf16.msra.mxu0 %v2383_v39 }
 0x160   :  { %1509 = vmatprep.subr.bf16.mxu0 %v2388_v40  ;;  %1547 = vmatpush1.bf16.msra.mxu1 %v2425_v5 }
 0x161   :  { %1548 = vmatprep.subr.bf16.mxu1 %v2430_v6  ;;  %v2447_v6 = vld [vmem:[#allocation11 + $0x38] sm:$0xff]  }
 0x163   :  { %1510 = vmatpush1.bf16.msra.mxu0 %v2386_v41 }
 0x164   :  { %1511 = vmatprep.subr.bf16.mxu0 %v2391_v42  ;;  %1549 = vmatpush1.bf16.msra.mxu1 %v2428_v7  ;;  %v1199_v42 = vrot.slane %v1194_v32, %v2760_v20  ;;  %v2448_v7 = vld [vmem:[#allocation11 + $0x70] sm:$0xff]  }
 0x165   :  { %1550 = vmatprep.subr.bf16.mxu1 %v2433_v8  ;;  %v2449_v8 = vld [vmem:[#allocation11 + $0x30] sm:$0xff]  }
 0x167   :  { %1512 = vmatpush1.bf16.msra.mxu0 %v2389_v43 }
 0x168   :  { %1513 = vmatprep.subr.bf16.mxu0 %v2394_v44  ;;  %1551 = vmatpush1.bf16.msra.mxu1 %v2431_v9  ;;  %v2450_v9 = vld [vmem:[#allocation11 + $0x68] sm:$0xff]  }
 0x169   :  { %1552 = vmatprep.subr.bf16.mxu1 %v2436_v10  ;;  %v2451_v10 = vld [vmem:[#allocation11 + $0x28] sm:$0xff]  }
 0x16b   :  { %1514 = vmatpush1.bf16.msra.mxu0 %v2392_v45 }
 0x16c   :  { %1515 = vmatprep.subr.bf16.mxu0 %v2397_v46  ;;  %1553 = vmatpush1.bf16.msra.mxu1 %v2434_v11  ;;  %v2452_v11 = vld [vmem:[#allocation11 + $0x60] sm:$0xff]  }
 0x16d   :  { %1554 = vmatprep.subr.bf16.mxu1 %v2439_v12  ;;  %v2453_v12 = vld [vmem:[#allocation11 + $0x20] sm:$0xff]  }
 0x16f   :  { %1516 = vmatpush1.bf16.msra.mxu0 %v2395_v47 }
 0x170   :  { %1517 = vmatprep.subr.bf16.mxu0 %v2400_v48  ;;  %1555 = vmatpush1.bf16.msra.mxu1 %v2437_v13  ;;  %v2454_v13 = vld [vmem:[#allocation11 + $0x58] sm:$0xff]  }
 0x171   :  { %1556 = vmatprep.subr.bf16.mxu1 %v2442_v14  ;;  %v2455_v14 = vld [vmem:[#allocation11 + $0x18] sm:$0xff]  }
 0x173   :  { %1518 = vmatpush2.bf16.msra.mxu0 %v2398_v49 }
 0x174   :  { %1519 = vmatprep.subr.bf16.mxu0 %v2403_v50  ;;  %1557 = vmatpush1.bf16.msra.mxu1 %v2440_v15  ;;  %v1179_v50 = vrot.slane %v1166_v18, %v305_v26  ;;  %v2446_v26 = vld [vmem:[#allocation11 + $0x78] sm:$0xff]   ;;  %v2456_v15 = vld [vmem:[#allocation11 + $0x50] sm:$0xff]   ;;  %v2459_v18 = vld [vmem:[#allocation11 + $0x8] sm:$0xff]  }
 0x175   :  { %1558 = vmatprep.subr.bf16.mxu1 %v2445_v16  ;;  %v2457_v16 = vld [vmem:[#allocation11 + $0x10] sm:$0xff]  }
 0x177   :  { %1520 = vmatpush2.bf16.msra.mxu0 %v2401_v51 }
 0x178   :  { %1521 = vmatprep.subr.bf16.mxu0 %v2406_v52  ;;  %1559 = vmatpush1.bf16.msra.mxu1 %v2443_v17  ;;  %v2458_v17 = vld [vmem:[#allocation11 + $0x48] sm:$0xff]  }
 0x179   :  { %2164 = vmatprep.subr.bf16.mxu1 %v2446_v26 }
 0x17b   :  { %1522 = vmatpush2.bf16.msra.mxu0 %v2404_v53  ;;  %v1185_v53 = vpack.c.bf16 %v1179_v50, %v1179_v50 }
 0x17c   :  { %1523 = vmatprep.subr.bf16.mxu0 %v2409_v54 }
 0x17f   :  { %1524 = vmatpush2.bf16.msra.mxu0 %v2407_v55 }
 0x180   :  { %1525 = vmatprep.subr.bf16.mxu0 %v2412_v56 }
 0x183   :  { %1526 = vmatpush2.bf16.msra.mxu0 %v2410_v57 }
 0x184   :  { %1527 = vmatprep.subr.bf16.mxu0 %v2415_v58  ;;  %v1201_v58 = vpack.i.b16 %v1185_v53, %v1185_v53 }
 0x186   :  { %v1206_v3 = vrot.slane %v1201_v58, %v2760_v20  ;;  %v2469_v58 = vld [vmem:[#allocation13] sm:$0xff]  }
 0x187   :  { %1528 = vmatpush2.bf16.msra.mxu0 %v2413_v59 }
 0x188   :  { %1529 = vmatprep.subr.bf16.mxu0 %v2418_v60 }
 0x18b   :  { %1530 = vmatpush2.bf16.msra.mxu0 %v2416_v61 }
 0x18c   :  { %1531 = vmatprep.subr.bf16.mxu0 %v2421_v62 }
 0x18f   :  { %1532 = vmatpush2.bf16.msra.mxu0 %v2419_v4 }
 0x1f2   :  { %v1029_v19 = vpop.f32.mrf.mxu0 }
 0x1f4   :  { %v1031_v24 = vpop.f32.mrf.mxu0 }
 0x1f6   :  { %v1033_v29 = vpop.f32.mrf.mxu0 }
 0x1f8   :  { %v1035_v36 = vpop.f32.mrf.mxu0 }
 0x1fa   :  { %v1072_v28 = vpop.f32.mrf.mxu1 }
 0x1fb   :  { %v1073_v34 = vadd.f32 %v1072_v28, %v1029_v19  ;;  %v2460_v19 = vld [vmem:[#allocation11 + $0x40] sm:$0xff]  }
 0x1fc   :  { %v1074_v30 = vpop.f32.mrf.mxu1  ;;  %v2465_v28 = vld [vmem:[#allocation13 + $0x20] sm:$0xff]  }
 0x1fd   :  { %v1075_v39 = vadd.f32 %v1074_v30, %v1031_v24  ;;  %v2656_v24 = vmov 0.0  }
 0x1fe   :  { %v1076_v33 = vpop.f32.mrf.mxu1  ;;  %2195 = vmatprep.subr.bf16.mxu0 %v2656_v24 }
 0x1ff   :  { %v1077_v35 = vadd.f32 %v1076_v33, %v1033_v29  ;;  %v1589_v29 = vld [vmem:[%s2831_s6] sm:$0x3] }
 0x200   :  { %v1078_v38 = vpop.f32.mrf.mxu1  ;;  %v1594_v31 = vrot.slane %v1589_v29, %v2760_v20  ;;  %v1598_v32 = vrot.slane %v1589_v29, %v2763_v22 }
 0x201   :  { %v1163_v40 = vpack.c.bf16 %v1077_v35, %v1073_v34  ;;  %v1079_v41 = vadd.f32 %v1078_v38, %v1035_v36 }
 0x202   :  { %v1601_v34 = vpack.c.bf16 %v1594_v31, %v1594_v31  ;;  %v1602_v35 = vpack.c.bf16 %v1598_v32, %v1598_v32 }
 0x203   :  { %v1164_v43 = vpack.c.bf16 %v1079_v41, %v1075_v39  ;;  %v1207_v44 = vadd.bf16 %v1192_v37, %v1163_v40 }
 0x204   :  { %v1604_v39 = vpack.i.b16 %v1601_v34, %v1601_v34  ;;  %v1611_v40 = vpack.i.b16 %v1602_v35, %v1602_v35 }
 0x205   :  { %v1208_v45 = vadd.bf16 %v1199_v42, %v1164_v43  ;;  %v1210_v47 = vmax.bf16 %v2655_v1, %v1207_v44 }
 0x206   :  { %v1616_v22 = vrot.slane %v1611_v40, %v2760_v20 }
 0x207   :  { %v1211_v46 = vmax.bf16 %v2655_v1, %v1208_v45  ;;  %v1609_v45 = vrot.slane %v1604_v39, %v2760_v20 }
 0x209   :  { %1533 = vmatprep.mubr.bf16.mxu0 %v1211_v46 }
 0x20a   :  { %1534 = vmatmul.mubr.bf16.vlgmr.msra.gmra.mxu0 %v1210_v47 }
 0x20b   :  { %2196 = vmatpush3.bf16.msra.mxu0 %v2462_v23  ;;  %2211 = vmatprep.mubr.msk.bf16.mxu0 %vm2657_vm2, %v2656_v24 }
 0x20c   :  { %2197 = vmatprep.subr.bf16.mxu0 %v2656_v24 }
 0x20f   :  { %2198 = vmatpush3.bf16.msra.mxu0 %v2463_v25 }
 0x210   :  { %2199 = vmatprep.subr.bf16.mxu0 %v2656_v24 }
 0x212   :  { %v2136_v48 = vpop.f32.mrf.mxu0 }
 0x213   :  { %2200 = vmatpush3.bf16.msra.mxu0 %v2464_v27 }
 0x214   :  { %v2137_v49 = vpop.f32.mrf.mxu0  ;;  %2201 = vmatprep.subr.bf16.mxu0 %v2656_v24 }
 0x215   :  { %v2138_v60 = vadd.f32 %v2137_v49, %v2136_v48 }
 0x216   :  { %v2139_v51 = vpop.f32.mrf.mxu0 }
 0x217   :  { %2202 = vmatpush3.bf16.msra.mxu0 %v2465_v28 }
 0x218   :  { %v2140_v55 = vpop.f32.mrf.mxu0  ;;  %2203 = vmatprep.subr.bf16.mxu0 %v2656_v24 }
 0x219   :  { %v2141_v61 = vadd.f32 %v2140_v55, %v2139_v51  ;;  %v2466_v55 = vld [vmem:[#allocation13 + $0x18] sm:$0xff]  }
 0x21a   :  { %v2158_v52 = vpop.f32.mrf.mxu1 }
 0x21b   :  { %2204 = vmatpush3.bf16.msra.mxu0 %v2466_v55 }
 0x21c   :  { %v2159_v54 = vpop.f32.mrf.mxu1  ;;  %2205 = vmatprep.subr.bf16.mxu0 %v2656_v24 }
 0x21d   :  { %v2160_v57 = vadd.f32 %v2159_v54, %v2158_v52 }
 0x21e   :  { %v2161_v56 = vpop.f32.mrf.mxu1 }
 0x21f   :  { %v1157_v63 = vadd.f32 %v2160_v57, %v2138_v60  ;;  %v2468_v57 = vld [vmem:[#allocation13 + $0x8] sm:$0xff]  }
 0x220   :  { %v2162_v59 = vpop.f32.mrf.mxu1 }
 0x221   :  { %v2163_v62 = vadd.f32 %v2162_v59, %v2161_v56  ;;  %v2467_v56 = vld [vmem:[#allocation13 + $0x10] sm:$0xff]   ;;  %v1791_v59 = vld [vmem:[%s2833_s8] sm:$0x1]  ;;  %s2658_s8 = smov [#allocation14]  }
 0x222   :  { %2206 = vmatpush3.bf16.msra.mxu0 %v2467_v56  ;;  %v1792_v60 = vpack.c.bf16 %v1791_v59, %v1791_v59  ;;  %s1927_s19 = sshll.u32 %s2658_s8, 4  ;;  %s1928_s19 = int_to_ptr.vmem [resolvable:$true] %s1927_s19 }
 0x223   :  { %v1160_v0 = vadd.f32 %v2163_v62, %v2141_v61  ;;  %2207 = vmatprep.subr.bf16.mxu0 %v2656_v24  ;;  %s2610_s22 = scalar_lea.vmem %s1928_s19, 256  ;;  %p2615_p8 = scmp.lt.s32.totalorder %s1928_s19, %s1928_s19 }
 0x224   :  { %p2611_p7 = scmp.ne.s32.totalorder %s1928_s19, %s2610_s22  ;;  %p2616_p9 = scmp.lt.s32.totalorder %s2610_s22, %s2610_s22 }
 0x225   :  { %v1165_v4 = vpack.c.bf16 %v1160_v0, %v1157_v63  ;;  %v1794_v63 = vpack.i.b16 %v1792_v60, %v1792_v60 }
 0x226   :  { %2208 = vmatpush3.bf16.msra.mxu0 %v2468_v57  ;;  %p2617_p10 = por %p2616_p9, %p2615_p8 }
 0x227   :  { %v1209_v5 = vadd.bf16 %v1206_v3, %v1165_v4  ;;  %2209 = vmatprep.subr.bf16.mxu0 %v2656_v24 }
 0x228   :  { %p2618_p11 = pnand %p2617_p10, %p2611_p7 }
 0x229   :  { %v1212_v2 = vmax.bf16 %v2655_v1, %v1209_v5 }
 0x22a   :  { %2210 = vmatpush3.bf16.msra.mxu0 %v2469_v58 }
 0x22b   :  { %1577 = vmatmul.mubr.bf16.vlgmr.msra.gmra.mxu1 %v1212_v2  ;;  %v1799_v2 = vrot.slane %v1794_v63, %v2760_v20 }
 0x22c   :  { %2165 = vmatpush3.bf16.msra.mxu1 %v2447_v6 }
 0x22d   :  { %2166 = vmatprep.subr.bf16.mxu1 %v2448_v7 }
 0x230   :  { %2167 = vmatpush3.bf16.msra.mxu1 %v2449_v8  ;;  %v1908_v8 = vld [vmem:[%s2835_s10] sm:$0x1] }
 0x231   :  { %2168 = vmatprep.subr.bf16.mxu1 %v2450_v9  ;;  %v1909_v9 = vpack.c.bf16 %v1908_v8, %v1908_v8 }
 0x234   :  { %2169 = vmatpush3.bf16.msra.mxu1 %v2451_v10  ;;  %v1911_v10 = vpack.i.b16 %v1909_v9, %v1909_v9 }
 0x235   :  { %2170 = vmatprep.subr.bf16.mxu1 %v2452_v11 }
 0x238   :  { %2171 = vmatpush3.bf16.msra.mxu1 %v2453_v12 }
 0x239   :  { %2172 = vmatprep.subr.bf16.mxu1 %v2454_v13  ;;  %v1916_v13 = vrot.slane %v1911_v10, %v2760_v20 }
 0x23c   :  { %2173 = vmatpush3.bf16.msra.mxu1 %v2455_v14 }
 0x23d   :  { %2174 = vmatprep.subr.bf16.mxu1 %v2456_v15 }
 0x240   :  { %2175 = vmatpush3.bf16.msra.mxu1 %v2457_v16 }
 0x241   :  { %2176 = vmatprep.subr.bf16.mxu1 %v2458_v17 }
 0x244   :  { %2177 = vmatpush3.bf16.msra.mxu1 %v2459_v18 }
 0x245   :  { %2178 = vmatprep.subr.bf16.mxu1 %v2460_v19 }
 0x248   :  { %2179 = vmatpush3.bf16.msra.mxu1 %v2461_v21 }
 0x2ca   :  { %v1535_v30 = vpop.f32.mrf.mxu0 }
 0x2cc   :  { %v1537_v33 = vpop.f32.mrf.mxu0 }
 0x2ce   :  { %v1539_v37 = vpop.f32.mrf.mxu0 }
 0x2d0   :  { %v1541_v44 = vpop.f32.mrf.mxu0 }
 0x2eb   :  { %v1578_v36 = vpop.f32.mrf.mxu1 }
 0x2ec   :  { %v1579_v42 = vadd.f32 %v1578_v36, %v1535_v30 }
 0x2ed   :  { %v1580_v38 = vpop.f32.mrf.mxu1 }
 0x2ee   :  { %v1581_v47 = vadd.f32 %v1580_v38, %v1537_v33 }
 0x2ef   :  { %v1582_v41 = vpop.f32.mrf.mxu1 }
 0x2f0   :  { %v1583_v43 = vadd.f32 %v1582_v41, %v1539_v37 }
 0x2f1   :  { %v1584_v46 = vpop.f32.mrf.mxu1 }
 0x2f2   :  { %v1587_v48 = vpack.c.bf16 %v1583_v43, %v1579_v42  ;;  %v1585_v49 = vadd.f32 %v1584_v46, %v1541_v44 }
 0x2f4   :  { %v1588_v50 = vpack.c.bf16 %v1585_v49, %v1581_v47  ;;  %v1617_v51 = vadd.bf16 %v1609_v45, %v1587_v48 }
 0x2f6   :  { %v1618_v52 = vadd.bf16 %v1616_v22, %v1588_v50  ;;  %v1619_v54 = vmax.bf16 %v2655_v1, %v1617_v51 }
 0x2f8   :  { %v1620_v53 = vmax.bf16 %v2655_v1, %v1618_v52 }
 0x2fa   :  { %1781 = vmatprep.mubr.bf16.mxu1 %v1620_v53 }
 0x2fb   :  { %1782 = vmatmul.mubr.bf16.vlgmr.msra.gmra.mxu1 %v1619_v54 }
 0x3bb   :  { %v2180_v61 = vpop.f32.mrf.mxu1 }
 0x3bd   :  { %v2181_v62 = vpop.f32.mrf.mxu1 }
 0x3be   :  { %v2182_v4 = vadd.f32 %v2181_v62, %v2180_v61 }
 0x3bf   :  { %v2183_v0 = vpop.f32.mrf.mxu1 }
 0x3c1   :  { %v2184_v3 = vpop.f32.mrf.mxu1 }
 0x3c2   :  { %v2185_v5 = vadd.f32 %v2184_v3, %v2183_v0 }
 0x3c4   :  { %v1790_v26 = vpack.c.bf16 %v2185_v5, %v2182_v4 }
 0x3c6   :  { %v1800_v6 = vadd.bf16 %v1799_v2, %v1790_v26 }
 0x3c8   :  { %v1801_v7 = vmax.bf16 %v2655_v1, %v1800_v6 }
 0x3ca   :  { %2212 = vmatmul.mubr.bf16.vlgmr.msra.gmra.mxu0 %v1801_v7 }
 0x48a   :  { %v1900_v11 = vpop.f32.mrf.mxu0 }
 0x48c   :  { %v2213_v12 = vpop.f32.mrf.mxu0 }
 0x48e   :  { %v1903_v14 = vpop.f32.mrf.mxu0 }
 0x48f   :  { %v1907_v15 = vpack.c.bf16 %v1903_v14, %v1900_v11 }
 0x490   :  { %v2214_v16 = vpop.f32.mrf.mxu0 }
 0x491   :  { %v1917_v17 = vadd.bf16 %v1916_v13, %v1907_v15 }
 0x493   :  { %v1918_v18 = vunpack.c.l.bf16 %v1917_v17  ;;  %v1919_v19 = vunpack.c.h.bf16 %v1917_v17 }
 0x495   :  { %1920 = vst [vmem:[#allocation14] sm:$0xff] %v1918_v18  ;;  %1921 = vst [vmem:[#allocation14 + $0x8] sm:$0xff] %v1919_v19 }
 0x496   :  { %2621 = shalt.err (!%p2618_p11)
}
 0x497   :  { %1933 = dma.vmem_to_hbm [thread:$0]  %s1928_s19, 256, %s2836_s11, [#allocation4], %s2650_s20, %s2650_s20, %s2651_s21  }
 0x498   :  { %2638 = dma.done.wait [#allocation4], 256  }
 0x499   :  { %2639 = vsyncadd [#allocation4], 4294967040 }
 0x49a   :  { %1937 = vsyncpa [#allocation3], 1 }
 0x49b   :  { %1938 = vsyncpa [#allocation6], 1 }
 0x49c   :  { %1939 = vsyncpa [#allocation9], 1 }
 0x49d   :  { %1940 = vsyncpa [#allocation12], 1 }
 0x49e   :  { %1941 = vsyncpa [#allocation4], 1 }

</bundles_post_ra>
